<compile_context>
chip_gen: v6e
topology: v6e:2x2x1
jax: 0.10.0
libtpu: 0.0.40
codegen_flags: <defaults>
</compile_context>

<pallas_src>
import jax
import jax.numpy as jnp
from jax import lax
from jax.experimental import pallas as pl
from jax.experimental.pallas import tpu as pltpu

_LANE = 128
_SUBLANE = 8


def _round_up(x, m):
    return (x + m - 1) // m * m


# ---------------------------------------------------------------------------
# Kernel A: logits only (targets=None path). Row axis is parallel-safe.
# ---------------------------------------------------------------------------
def _embed_kernel(idx_ref, table_ref, logits_ref):
    tn = idx_ref.shape[0]
    p = table_ref.shape[0]
    cols = lax.broadcasted_iota(jnp.int32, (tn, p), 1)
    onehot = (cols == idx_ref[...]).astype(jnp.float32)          # idx_ref is (tn, 1)
    logits_ref[...] = jnp.dot(onehot, table_ref[...],
                              preferred_element_type=jnp.float32,
                              precision=lax.Precision.HIGHEST)


# ---------------------------------------------------------------------------
# Kernel B: fused embedding lookup + cross-entropy partial sums.
#   Column C of the padded table holds the precomputed per-vocab-row logsumexp,
#   so the same MXU gather that produces the logits also produces the LSE.
# ---------------------------------------------------------------------------
def _make_fused_kernel(c_valid):
    def kernel(idx_ref, tgt_ref, table_ref, logits_ref, partial_ref):
        tn = idx_ref.shape[0]
        p = table_ref.shape[1]                                   # padded class dim

        cols = lax.broadcasted_iota(jnp.int32, (tn, p), 1)
        onehot = (cols == idx_ref[...]).astype(jnp.float32)
        logits = jnp.dot(onehot, table_ref[...],
                         preferred_element_type=jnp.float32,
                         precision=lax.Precision.HIGHEST)        # (tn, p)
        logits_ref[...] = logits                                 # lane-dense store

        # Precomputed logsumexp rides along in padded column c_valid.
        lse = logits[:, c_valid:c_valid + 1]                     # (tn, 1)
        picked = jnp.sum(jnp.where(cols == tgt_ref[...], logits, 0.0),
                         axis=-1, keepdims=True)                 # logit of the target
        row_valid = tgt_ref[...] >= 0                            # padded rows: target = -1
        per_row = jnp.where(row_valid, lse - picked, 0.0)        # (tn, 1)

        # Per-block partial sum -> own output block (row axis stays parallel).
        partial_ref[...] = jnp.broadcast_to(jnp.sum(per_row), (1, _SUBLANE, _LANE))

    return kernel


# ---------------------------------------------------------------------------
# Wrapper (mirrors BigramLanguageModel.forward)
# ---------------------------------------------------------------------------
def bigram_forward(index, table, targets=None, *, row_tile=1024, crop_logits=True):
    """index: (B, T) int32; table: (V, V) float32; targets: optional (B, T) int32.

    Returns (logits, loss). Matching PyTorch: logits is (B, T, C) when targets
    is None, and (B*T, C) when targets are given.
    """
    B, T = index.shape
    V, C = table.shape
    assert V == C, "bigram embedding table must be square (vocab, vocab)"
    N = B * T

    # Row tile: multiple of 8, no larger than the (8-rounded) row count.
    tn = min(_round_up(max(int(row_tile), _SUBLANE), _SUBLANE), _round_up(N, _SUBLANE))
    Np = _round_up(N, tn)
    grid = (Np // tn,)

    idx_pad = jnp.zeros((Np, 1), jnp.int32).at[:N, 0].set(
        index.reshape(N).astype(jnp.int32))

    if targets is None:
        P = _round_up(C, _LANE)
        table_pad = jnp.zeros((P, P), jnp.float32).at[:V, :C].set(
            table.astype(jnp.float32))
        logits_pad = pl.pallas_call(
            _embed_kernel,
            out_shape=jax.ShapeDtypeStruct((Np, P), jnp.float32),
            grid=grid,
            in_specs=[
                pl.BlockSpec((tn, 1), lambda i: (i, 0)),
                pl.BlockSpec((P, P), lambda i: (0, 0)),
            ],
            out_specs=pl.BlockSpec((tn, P), lambda i: (i, 0)),
            compiler_params=pltpu.CompilerParams(
                dimension_semantics=("parallel",)),
        )(idx_pad, table_pad)
        if crop_logits:
            logits = logits_pad[:N, :C].reshape(B, T, C)
        else:
            logits = logits_pad
        return logits, None

    # Padded class dim leaves at least one spare column for the LSE.
    P = _round_up(C + 1, _LANE)
    lse_rows = jax.scipy.special.logsumexp(table.astype(jnp.float32), axis=-1)  # (V,)
    table_pad = (jnp.zeros((P, P), jnp.float32)
                 .at[:V, :C].set(table.astype(jnp.float32))
                 .at[:V, C].set(lse_rows))

    # Padded rows get target = -1 so they are excluded from the loss sum.
    tgt_pad = jnp.full((Np, 1), -1, jnp.int32).at[:N, 0].set(
        targets.reshape(N).astype(jnp.int32))

    G = grid[0]
    kernel = _make_fused_kernel(c_valid=C)
    logits_pad, partials = pl.pallas_call(
        kernel,
        out_shape=(
            jax.ShapeDtypeStruct((Np, P), jnp.float32),
            jax.ShapeDtypeStruct((G, _SUBLANE, _LANE), jnp.float32),
        ),
        grid=grid,
        in_specs=[
            pl.BlockSpec((tn, 1), lambda i: (i, 0)),             # token ids
            pl.BlockSpec((tn, 1), lambda i: (i, 0)),             # targets
            pl.BlockSpec((P, P), lambda i: (0, 0)),              # table + LSE column
        ],
        out_specs=(
            pl.BlockSpec((tn, P), lambda i: (i, 0)),             # logits, lane-dense
            pl.BlockSpec((1, _SUBLANE, _LANE), lambda i: (i, 0, 0)),  # per-block partial
        ),
        compiler_params=pltpu.CompilerParams(
            dimension_semantics=("parallel",)),                  # no carried state
    )(idx_pad, tgt_pad, table_pad)

    loss = jnp.sum(partials[:, 0, 0]) * (1.0 / N)
    if crop_logits:
        logits = logits_pad[:N, :C]                              # PyTorch: (B*T, C)
    else:
        logits = logits_pad
    return logits, loss


# ---------------------------------------------------------------------------
# Main
# ---------------------------------------------------------------------------
if __name__ == "__main__":
    B, T, vocab_size = 2, 8, 65

    key = jax.random.PRNGKey(0)
    k_table, k_idx, k_tgt = jax.random.split(key, 3)

    # nn.Embedding(vocab_size, vocab_size) weights ~ N(0, 1).
    table = jax.random.normal(k_table, (vocab_size, vocab_size), dtype=jnp.float32)
    index = jax.random.randint(k_idx, (B, T), 0, vocab_size, dtype=jnp.int32)
    targets = jax.random.randint(k_tgt, (B, T), 0, vocab_size, dtype=jnp.int32)

    # Fused (logits + loss) path.
    logits, loss = bigram_forward(index, table, targets)
    logits = jax.block_until_ready(logits)
    loss = jax.block_until_ready(loss)

    # targets=None path.
    logits_only, loss_none = bigram_forward(index, table, None)
    logits_only = jax.block_until_ready(logits_only)
    assert loss_none is None
    assert logits_only.shape == (B, T, vocab_size)

    # Pure-JAX reference.
    ref_logits_btc = table[index]                                  # (B, T, C)
    flat = ref_logits_btc.reshape(B * T, vocab_size)
    tgt = targets.reshape(B * T)
    log_probs = flat - jax.scipy.special.logsumexp(flat, axis=-1, keepdims=True)
    ref_loss = -jnp.mean(log_probs[jnp.arange(B * T), tgt])

    assert logits.shape == (B * T, vocab_size)                     # PyTorch semantics
    assert jnp.allclose(logits, flat, atol=1e-5, rtol=1e-5)
    assert jnp.allclose(logits_only, ref_logits_btc, atol=1e-5, rtol=1e-5)
    assert jnp.allclose(loss, ref_loss, atol=1e-5, rtol=1e-5)

    print("KERNEL_OK")
</pallas_src>

<mosaic_0001>
module attributes {stable_mosaic.version = 11 : i64} {
  func.func @kernel(%arg0: i32, %arg1: memref<16x1xi32, #tpu.memory_space<vmem>>, %arg2: memref<16x1xi32, #tpu.memory_space<vmem>>, %arg3: memref<128x128xf32, #tpu.memory_space<vmem>>, %arg4: memref<16x128xf32, #tpu.memory_space<vmem>>, %arg5: memref<1x8x128xf32, #tpu.memory_space<vmem>>) attributes {dimension_semantics = [#tpu.dimension_semantics<parallel>], iteration_bounds = array<i64: 1>, scalar_prefetch = 0 : i64, scratch_operands = 0 : i64, tpu.core_type = #tpu.core_type<tc>, window_params = [{transform_indices = @transform_0, window_bounds = array<i64: 16, 1>}, {transform_indices = @transform_1, window_bounds = array<i64: 16, 1>}, {pipeline_mode = #tpu.pipeline_mode<synchronous>, transform_indices = @transform_2, window_bounds = array<i64: 128, 128>}, {transform_indices = @transform_3, window_bounds = array<i64: 16, 128>}, {transform_indices = @transform_4, window_bounds = array<i64: 1, 8, 128>}]} {
    %0 = tpu.iota {dimensions = array<i32: 1>} : vector<16x128xi32>
    %c0 = arith.constant 0 : index
    %c0_0 = arith.constant 0 : index
    %1 = vector.load %arg1[%c0, %c0_0] : memref<16x1xi32, #tpu.memory_space<vmem>>, vector<16x1xi32>
    %2 = vector.broadcast %1 : vector<16x1xi32> to vector<16x128xi32>
    %3 = arith.cmpi eq, %0, %2 : vector<16x128xi32>
    %4 = arith.extui %3 : vector<16x128xi1> to vector<16x128xi32>
    %5 = arith.sitofp %4 : vector<16x128xi32> to vector<16x128xf32>
    %c0_1 = arith.constant 0 : index
    %c0_2 = arith.constant 0 : index
    %6 = vector.load %arg3[%c0_1, %c0_2] : memref<128x128xf32, #tpu.memory_space<vmem>>, vector<128x128xf32>
    %cst = arith.constant dense<0.000000e+00> : vector<16x128xf32>
    %7 = tpu.matmul %5, %6, %cst {dimension_numbers = #tpu.dot_dimension_numbers<[1], [0], [0], [1], [0, 0, 1, 1], [], []>, precision = #tpu.contract_precision<fp32>} : vector<16x128xf32>, vector<128x128xf32>, vector<16x128xf32> -> vector<16x128xf32>
    %c0_3 = arith.constant 0 : index
    %c0_4 = arith.constant 0 : index
    %8 = vector.load %arg4[%c0_3, %c0_4] : memref<16x128xf32, #tpu.memory_space<vmem>>, vector<16x128xf32>
    tpu.vector_store %arg4[%c0_3, %c0_4], %7 {strides = array<i32>} : memref<16x128xf32, #tpu.memory_space<vmem>>, vector<16x128xf32>,
    %9 = vector.extract_strided_slice %7 {offsets = [0, 65], sizes = [16, 1], strides = [1, 1]} : vector<16x128xf32> to vector<16x1xf32>
    %c0_5 = arith.constant 0 : index
    %c0_6 = arith.constant 0 : index
    %10 = vector.load %arg2[%c0_5, %c0_6] : memref<16x1xi32, #tpu.memory_space<vmem>>, vector<16x1xi32>
    %11 = vector.broadcast %10 : vector<16x1xi32> to vector<16x128xi32>
    %12 = arith.cmpi eq, %0, %11 : vector<16x128xi32>
    %cst_7 = arith.constant 0.000000e+00 : f32
    %13 = vector.broadcast %cst_7 : f32 to vector<16x128xf32>
    %14 = arith.select %12, %7, %13 : vector<16x128xi1>, vector<16x128xf32>
    %cst_8 = arith.constant dense<0.000000e+00> : vector<16xf32>
    %15 = vector.multi_reduction <add>, %14, %cst_8 [1] : vector<16x128xf32> to vector<16xf32>
    %16 = vector.shape_cast %15 : vector<16xf32> to vector<16x1xf32>
    %c0_9 = arith.constant 0 : index
    %c0_10 = arith.constant 0 : index
    %17 = vector.load %arg2[%c0_9, %c0_10] : memref<16x1xi32, #tpu.memory_space<vmem>>, vector<16x1xi32>
    %c0_i32 = arith.constant 0 : i32
    %18 = vector.broadcast %c0_i32 : i32 to vector<16x1xi32>
    %19 = arith.cmpi sge, %17, %18 : vector<16x1xi32>
    %20 = arith.subf %9, %16 : vector<16x1xf32>
    %cst_11 = arith.constant 0.000000e+00 : f32
    %21 = vector.broadcast %cst_11 : f32 to vector<16x1xf32>
    %22 = arith.select %19, %20, %21 : vector<16x1xi1>, vector<16x1xf32>
    %23 = vector.shape_cast %22 : vector<16x1xf32> to vector<1x16x1xf32>
    %cst_12 = arith.constant dense<0.000000e+00> : vector<1xf32>
    %24 = vector.multi_reduction <add>, %23, %cst_12 [1, 2] : vector<1x16x1xf32> to vector<1xf32>
    %25 = vector.shape_cast %24 : vector<1xf32> to vector<1x1x1xf32>
    %26 = vector.extract %25[0, 0, 0] : f32 from vector<1x1x1xf32>
    %27 = vector.broadcast %26 : f32 to vector<1x8x128xf32>
    %c0_13 = arith.constant 0 : index
    %c0_14 = arith.constant 0 : index
    %c0_15 = arith.constant 0 : index
    %28 = vector.load %arg5[%c0_13, %c0_14, %c0_15] : memref<1x8x128xf32, #tpu.memory_space<vmem>>, vector<1x8x128xf32>
    tpu.vector_store %arg5[%c0_13, %c0_14, %c0_15], %27 {strides = array<i32>} : memref<1x8x128xf32, #tpu.memory_space<vmem>>, vector<1x8x128xf32>,
    return
  }
  func.func @transform_0(%arg0: i32) -> (i32, i32) {
    %c0_i32 = arith.constant 0 : i32
    %c0_i32_0 = arith.constant 0 : i32
    return %arg0, %c0_i32 : i32, i32
  }
  func.func @transform_1(%arg0: i32) -> (i32, i32) {
    %c0_i32 = arith.constant 0 : i32
    %c0_i32_0 = arith.constant 0 : i32
    return %arg0, %c0_i32 : i32, i32
  }
  func.func @transform_2(%arg0: i32) -> (i32, i32) {
    %c0_i32 = arith.constant 0 : i32
    %c0_i32_0 = arith.constant 0 : i32
    %c0_i32_1 = arith.constant 0 : i32
    return %c0_i32, %c0_i32_0 : i32, i32
  }
  func.func @transform_3(%arg0: i32) -> (i32, i32) {
    %c0_i32 = arith.constant 0 : i32
    %c0_i32_0 = arith.constant 0 : i32
    return %arg0, %c0_i32 : i32, i32
  }
  func.func @transform_4(%arg0: i32) -> (i32, i32, i32) {
    %c0_i32 = arith.constant 0 : i32
    %c0_i32_0 = arith.constant 0 : i32
    %c0_i32_1 = arith.constant 0 : i32
    return %arg0, %c0_i32, %c0_i32_0 : i32, i32, i32
  }
}

</mosaic_0001>

<bundles_post_ra>
// kernel: tpu_custom_call.1
= control target key start
LH: loop header
LB: loop body
LE: loop exit
PB: predicated region body
PF: predicated region fallthrough
CT: control target
= control target key end

     0   :  { %10 = vsyncpa [#allocation3], 0  ;;  %s1667_s0 = inlined_call_operand.vmem [shape: s32[16,1], index: 0, kind: input, shape index: {}]   ;;  %s1668_s1 = inlined_call_operand.vmem [shape: s32[16,1], index: 1, kind: input, shape index: {}]   ;;  %s1669_s2 = inlined_call_operand.hbm [shape: f32[128,128], index: 2, kind: input, shape index: {}]   ;;  %s1670_s3 = inlined_call_operand.hbm [shape: f32[16,128], index: 3, kind: output, shape index: {0}]   ;;  %s1671_s4 = inlined_call_operand.hbm [shape: f32[1,8,128], index: 4, kind: output, shape index: {1}]  }
   0x1   :  { %11 = vsyncpa [#allocation4], 0 }
   0x2   :  { %12 = vsyncpa [#allocation7], 0  ;;  %s1231_s15 = smov [#allocation2]  }
   0x3   :  { %s22_s16 = sshll.u32 %s1231_s15, 4  ;;  %s23_s16 = int_to_ptr.vmem [resolvable:$true] %s22_s16 }
   0x4   :  { %s1173_s17 = scalar_lea.vmem %s23_s16, 2048  ;;  %p1178_p1 = scmp.lt.s32.totalorder %s23_s16, %s23_s16 }
   0x5   :  { %p1174_p0 = scmp.ne.s32.totalorder %s23_s16, %s1173_s17  ;;  %p1179_p2 = scmp.lt.s32.totalorder %s1173_s17, %s1173_s17 }
   0x7   :  { %p1180_p3 = por %p1179_p2, %p1178_p1 }
   0x9   :  { %p1181_p4 = pnand %p1180_p3, %p1174_p0 }
   0xb   :  { %1184 = shalt.err (!%p1181_p4)
}
   0xc   :  { %s1232_s18 = smov 128   ;;  %s1233_s19 = smov 8  }
   0xd   :  { %28 = dma.hbm_to_vmem [thread:$0]  %s1669_s2, 2048, %s23_s16, [#allocation3], %s1232_s18, %s1232_s18, %s1233_s19  }
   0xe   :  { %1225 = dma.done.wait [#allocation3], 2048  }
   0xf   :  { %1226 = vsyncadd [#allocation3], 4294965248  ;;  %v1234_v0 = vmov 0   ;;  %v34_v1 = vld [vmem:[%s1667_s0] sm:$0xff]  ;;  %v35_v2 = vld [vmem:[%s1667_s0 + $0x8] sm:$0xff]  ;;  %vm780_vm6 = vcmask 7168  }
  0x10   :  { %1163 = vset.pattern.permute.xlu0 %v1234_v0  ;;  %1164 = vset.pattern.permute.xlu1 %v1234_v0  ;;  %v63_v3 = vld [vmem:[#allocation2 + $0x78] sm:$0xff]  ;;  %v62_v5 = vld [vmem:[#allocation2 + $0x70] sm:$0xff]  ;;  %v61_v6 = vld [vmem:[#allocation2 + $0x68] sm:$0xff]  ;;  %s1238_s28 = smov [#allocation5]  }
  0x11   :  { %37 = vperm.xlu0 %1163, %v34_v1   ;;  %v1277_v4 = vand.u32 4294901760, %v63_v3  ;;  %v60_v7 = vld [vmem:[#allocation2 + $0x60] sm:$0xff]  ;;  %v1279_v8 = vand.u32 4294901760, %v62_v5  ;;  %v1281_v9 = vand.u32 4294901760, %v61_v6  ;;  %v59_v11 = vld [vmem:[#allocation2 + $0x58] sm:$0xff]  ;;  %v58_v12 = vld [vmem:[#allocation2 + $0x50] sm:$0xff] }
  0x12   :  { %v1283_v10 = vand.u32 4294901760, %v60_v7  ;;  %v57_v13 = vld [vmem:[#allocation2 + $0x48] sm:$0xff]  ;;  %v1288_v15 = vand.u32 4294901760, %v59_v11  ;;  %v1291_v16 = vand.u32 4294901760, %v58_v12  ;;  %v56_v18 = vld [vmem:[#allocation2 + $0x40] sm:$0xff]  ;;  %v55_v35 = vld [vmem:[#allocation2 + $0x38] sm:$0xff] }
  0x13   :  { %v1286_v14 = vsub.f32 %v63_v3, %v1277_v4  ;;  %942 = vmatprep.subr.mxu0 %v1277_v4  ;;  %v1293_v17 = vand.u32 4294901760, %v57_v13  ;;  %v1296_v19 = vsub.f32 %v62_v5, %v1279_v8  ;;  %v1299_v20 = vsub.f32 %v61_v6, %v1281_v9  ;;  %v54_v39 = vld [vmem:[#allocation2 + $0x30] sm:$0xff]  ;;  %v53_v40 = vld [vmem:[#allocation2 + $0x28] sm:$0xff]  ;;  %v52_v43 = vld [vmem:[#allocation2 + $0x20] sm:$0xff]  ;;  %s800_s29 = sshll.u32 %s1238_s28, 4  ;;  %s801_s29 = int_to_ptr.vmem [resolvable:$true] %s800_s29 }
  0x14   :  { %v1302_v21 = vsub.f32 %v60_v7, %v1283_v10  ;;  %943 = vmatpush3.msra.mxu0 %v1277_v4  ;;  %v1305_v22 = vand.u32 4294901760, %v56_v18  ;;  %v1311_v24 = vsub.f32 %v59_v11, %v1288_v15  ;;  %v1314_v25 = vsub.f32 %v58_v12, %v1291_v16  ;;  %v51_v50 = vld [vmem:[#allocation2 + $0x18] sm:$0xff]  ;;  %v50_v57 = vld [vmem:[#allocation2 + $0x10] sm:$0xff]  ;;  %v49_v63 = vld [vmem:[#allocation2 + $0x8] sm:$0xff]  ;;  %s1185_s30 = scalar_lea.vmem %s801_s29, 256  ;;  %p1190_p6 = scmp.lt.s32.totalorder %s801_s29, %s801_s29 }
  0x15   :  { %40 = vperm.xlu0 %1163, %v35_v2   ;;  %v1308_v23 = vand.u32 4294901760, %v1286_v14  ;;  %944 = vmatprep.subr.mxu0 %v1279_v8  ;;  %v1318_v26 = vand.u32 4294901760, %v1296_v19  ;;  %v1321_v27 = vand.u32 4294901760, %v1299_v20  ;;  %v1328_v29 = vsub.f32 %v57_v13, %v1293_v17  ;;  %v48_v6 = vld [vmem:[#allocation2] sm:$0xff]  ;;  %p1186_p5 = scmp.ne.s32.totalorder %s801_s29, %s1185_s30  ;;  %p1191_p7 = scmp.lt.s32.totalorder %s1185_s30, %s1185_s30 }
  0x16   :  { %v1324_v28 = vand.u32 4294901760, %v1302_v21  ;;  %945 = vmatpush3.msra.mxu0 %v1279_v8  ;;  %v1333_v31 = vand.u32 4294901760, %v1311_v24  ;;  %v1342_v34 = vsub.f32 %v56_v18, %v1305_v22  ;;  %v1347_v38 = vand.u32 4294901760, %v1314_v25 }
  0x17   :  { %v169_v30 = vsub.f32 %v1286_v14, %v1308_v23  ;;  %946 = vmatprep.subr.mxu0 %v1281_v9  ;;  %v176_v32 = vsub.f32 %v1296_v19, %v1318_v26  ;;  %v183_v33 = vsub.f32 %v1299_v20, %v1321_v27  ;;  %v1351_v42 = vand.u32 4294901760, %v1328_v29  ;;  %p1192_p8 = por %p1191_p7, %p1190_p6 }
  0x18   :  { %947 = vmatpush3.msra.mxu0 %v1281_v9  ;;  %v190_v37 = vsub.f32 %v1302_v21, %v1324_v28  ;;  %v197_v45 = vsub.f32 %v1311_v24, %v1333_v31  ;;  %v1356_v46 = vand.u32 4294901760, %v55_v35  ;;  %v1360_v47 = vand.u32 4294901760, %v1342_v34 }
  0x19   :  { %v170_v36 = vand.u32 4294901760, %v169_v30  ;;  %948 = vmatprep.subr.mxu0 %v1283_v10  ;;  %v177_v41 = vand.u32 4294901760, %v176_v32  ;;  %v184_v44 = vand.u32 4294901760, %v183_v33  ;;  %v1363_v48 = vand.u32 4294901760, %v54_v39  ;;  %p1193_p9 = pnand %p1192_p8, %p1186_p5 }
  0x1a   :  { %949 = vmatpush3.msra.mxu0 %v1283_v10  ;;  %v1365_v49 = vand.u32 4294901760, %v53_v40  ;;  %v191_v51 = vand.u32 4294901760, %v190_v37  ;;  %v204_v52 = vsub.f32 %v1314_v25, %v1347_v38  ;;  %v1370_v53 = vsub.f32 %v55_v35, %v1356_v46 }
  0x1b   :  { %977 = vmatprep.subr.mxu1 %v170_v36  ;;  %950 = vmatprep.subr.mxu0 %v1288_v15  ;;  %v1373_v54 = vand.u32 4294901760, %v52_v43  ;;  %v211_v55 = vsub.f32 %v1328_v29, %v1351_v42  ;;  %v1378_v56 = vsub.f32 %v54_v39, %v1363_v48  ;;  %v198_v58 = vand.u32 4294901760, %v197_v45 }
  0x1c   :  { %978 = vmatpush3.msra.mxu1 %v170_v36  ;;  %951 = vmatpush3.msra.mxu0 %v1288_v15  ;;  %v1382_v59 = vand.u32 4294901760, %v1370_v53  ;;  %v1385_v60 = vsub.f32 %v53_v40, %v1365_v49  ;;  %v1388_v61 = vand.u32 4294901760, %v51_v50  ;;  %v218_v62 = vsub.f32 %v1342_v34, %v1360_v47 }
  0x1d   :  { %979 = vmatprep.subr.mxu1 %v177_v41  ;;  %952 = vmatprep.subr.mxu0 %v1291_v16  ;;  %v205_v0 = vand.u32 4294901760, %v204_v52  ;;  %v1394_v1 = vand.u32 4294901760, %v1378_v56  ;;  %v1397_v2 = vsub.f32 %v52_v43, %v1373_v54  ;;  %v1400_v3 = vand.u32 4294901760, %v50_v57 }
  0x1e   :  { %980 = vmatpush3.msra.mxu1 %v177_v41  ;;  %953 = vmatpush3.msra.mxu0 %v1291_v16  ;;  %v212_v5 = vand.u32 4294901760, %v211_v55  ;;  %v225_v7 = vsub.f32 %v1370_v53, %v1382_v59  ;;  %v1406_v11 = vand.u32 4294901760, %v1385_v60  ;;  %v1409_v12 = vsub.f32 %v51_v50, %v1388_v61 }
  0x1f   :  { %981 = vmatprep.subr.mxu1 %v184_v44  ;;  %954 = vmatprep.subr.mxu0 %v1293_v17  ;;  %v1412_v13 = vand.u32 4294901760, %v49_v63  ;;  %v219_v18 = vand.u32 4294901760, %v218_v62  ;;  %v232_v30 = vsub.f32 %v1378_v56, %v1394_v1  ;;  %v1418_v32 = vand.u32 4294901760, %v1397_v2 }
  0x20   :  { %982 = vmatpush3.msra.mxu1 %v184_v44  ;;  %955 = vmatpush3.msra.mxu0 %v1293_v17  ;;  %v1421_v33 = vsub.f32 %v50_v57, %v1400_v3  ;;  %v1424_v35 = vand.u32 4294901760, %v48_v6  ;;  %v226_v36 = vand.u32 4294901760, %v225_v7  ;;  %v239_v37 = vsub.f32 %v1385_v60, %v1406_v11 }
  0x21   :  { %983 = vmatprep.subr.mxu1 %v191_v51  ;;  %956 = vmatprep.subr.mxu0 %v1305_v22  ;;  %v1430_v39 = vand.u32 4294901760, %v1409_v12  ;;  %v1433_v40 = vsub.f32 %v49_v63, %v1412_v13  ;;  %v233_v41 = vand.u32 4294901760, %v232_v30  ;;  %v246_v43 = vsub.f32 %v1397_v2, %v1418_v32  ;;  %v1480_v30 = vld [vmem:[%s1668_s1 + $0x8] sm:$0xff] }
  0x22   :  { %984 = vmatpush3.msra.mxu1 %v191_v51  ;;  %957 = vmatpush3.msra.mxu0 %v1305_v22  ;;  %v1440_v44 = vand.u32 4294901760, %v1421_v33  ;;  %v1443_v45 = vsub.f32 %v48_v6, %v1424_v35  ;;  %v240_v50 = vand.u32 4294901760, %v239_v37  ;;  %vm767_vm4 = vcmp.ge.s32.totalorder %v1480_v30, 0 }
  0x23   :  { %985 = vmatprep.subr.mxu1 %v198_v58  ;;  %958 = vmatprep.subr.mxu0 %v1356_v46  ;;  %v253_v51 = vsub.f32 %v1409_v12, %v1430_v39  ;;  %v1450_v52 = vand.u32 4294901760, %v1433_v40  ;;  %v247_v55 = vand.u32 4294901760, %v246_v43  ;;  %v1235_v43 = vmov 0.0  }
  0x24   :  { %986 = vmatpush3.msra.mxu1 %v198_v58  ;;  %959 = vmatpush3.msra.mxu0 %v1356_v46  ;;  %v260_v57 = vsub.f32 %v1421_v33, %v1440_v44  ;;  %v1457_v58 = vand.u32 4294901760, %v1443_v45 }
  0x25   :  { %987 = vmatprep.subr.mxu1 %v205_v0  ;;  %960 = vmatprep.subr.mxu0 %v1363_v48  ;;  %v254_v62 = vand.u32 4294901760, %v253_v51  ;;  %v267_v63 = vsub.f32 %v1433_v40, %v1450_v52  ;;  %v1236_v51 = vmov 1.0  }
  0x26   :  { %988 = vmatpush3.msra.mxu1 %v205_v0  ;;  %961 = vmatpush3.msra.mxu0 %v1363_v48  ;;  %v261_v0 = vand.u32 4294901760, %v260_v57 }
  0x27   :  { %989 = vmatprep.subr.mxu1 %v212_v5  ;;  %962 = vmatprep.subr.mxu0 %v1365_v49  ;;  %v268_v6 = vand.u32 4294901760, %v267_v63 }
  0x28   :  { %990 = vmatpush3.msra.mxu1 %v212_v5  ;;  %963 = vmatpush3.msra.mxu0 %v1365_v49  ;;  %v274_v5 = vsub.f32 %v1443_v45, %v1457_v58 }
  0x29   :  { %991 = vmatprep.subr.mxu1 %v219_v18  ;;  %964 = vmatprep.subr.mxu0 %v1373_v54 }
  0x2a   :  { %992 = vmatpush3.msra.mxu1 %v219_v18  ;;  %965 = vmatpush3.msra.mxu0 %v1373_v54  ;;  %v275_v7 = vand.u32 4294901760, %v274_v5  ;;  %v1474_v18 = vld [vmem:[%s1668_s1] sm:$0xff]  ;;  %s1237_s1 = smov 63  }
  0x2b   :  { %993 = vmatprep.subr.mxu1 %v226_v36  ;;  %966 = vmatprep.subr.mxu0 %v1388_v61  ;;  %vm766_vm5 = vcmp.ge.s32.totalorder %v1474_v18, 0 }
  0x2c   :  { %994 = vmatpush3.msra.mxu1 %v226_v36  ;;  %967 = vmatpush3.msra.mxu0 %v1388_v61  ;;  %v32_v36 = vlaneseq }
  0x2d   :  { %995 = vmatprep.subr.mxu1 %v233_v41  ;;  %968 = vmatprep.subr.mxu0 %v1400_v3 }
  0x2e   :  { %996 = vmatpush3.msra.mxu1 %v233_v41  ;;  %969 = vmatpush3.msra.mxu0 %v1400_v3  ;;  %v1483_v37 = vand.u32 127, %v32_v36 }
  0x2f   :  { %997 = vmatprep.subr.mxu1 %v240_v50  ;;  %970 = vmatprep.subr.mxu0 %v1412_v13 }
  0x30   :  { %998 = vmatpush3.msra.mxu1 %v240_v50  ;;  %971 = vmatpush3.msra.mxu0 %v1412_v13 }
  0x31   :  { %999 = vmatprep.subr.mxu1 %v247_v55  ;;  %972 = vmatprep.subr.mxu0 %v1424_v35 }
  0x32   :  { %1000 = vmatpush3.msra.mxu1 %v247_v55  ;;  %973 = vmatpush3.msra.mxu0 %v1424_v35 }
  0x33   :  { %1001 = vmatprep.subr.mxu1 %v254_v62  ;;  %1012 = vmatprep.subr.mxu0 %v1286_v14 }
  0x34   :  { %1002 = vmatpush3.msra.mxu1 %v254_v62  ;;  %753 = vperm.xlu1 %1164, %v1474_v18  }
  0x35   :  { %1003 = vmatprep.subr.mxu1 %v261_v0 }
  0x36   :  { %1004 = vmatpush3.msra.mxu1 %v261_v0 }
  0x37   :  { %1005 = vmatprep.subr.mxu1 %v268_v6 }
  0x38   :  { %1006 = vmatpush3.msra.mxu1 %v268_v6  ;;  %756 = vperm.xlu1 %1164, %v1480_v30  }
  0x39   :  { %1007 = vmatprep.subr.mxu1 %v275_v7 }
  0x3a   :  { %1008 = vmatpush3.msra.mxu1 %v275_v7 }
  0x3b   :  { %1047 = vmatprep.subr.mxu1 %v1277_v4 }
  0x8c   :  { %v1485_v41 = vpop.permute.xlu0 %37 }
  0x8d   :  { %vm42_vm0 = vcmp.eq.s32.totalorder %v1483_v37, %v1485_v41 }
  0x8e   :  { %v826_v50 = vsel %vm42_vm0, 1.0, %v1235_v43  ;;  %1009 = vmatprep.mubr.msk.f32.mxu1 %vm42_vm0, %v1236_v51 }
  0x8f   :  { %v146_v55 = vsub.f32 %v826_v50, %v826_v50 }
  0x90   :  { %v1496_v57 = vpop.permute.xlu0 %40 }
  0x91   :  { %vm43_vm1 = vcmp.eq.s32.totalorder %v1483_v37, %v1496_v57  ;;  %v147_v62 = vand.u32 4294901760, %v146_v55 }
  0x92   :  { %v827_v63 = vsel %vm43_vm1, 1.0, %v1235_v43  ;;  %1010 = vmatmul.mubr.msk.f32.vlgmr.msra.gmra.mxu1 %vm43_vm1, %v1236_v51 }
  0x93   :  { %v1507_v0 = vsub.f32 %v827_v63, %v827_v63  ;;  %1048 = vmatpush3.msra.mxu1 %v1277_v4  ;;  %1079 = vmatprep.mubr.f32.mxu1 %v147_v62  ;;  %v148_v5 = vsub.f32 %v146_v55, %v147_v62 }
  0x94   :  { %1049 = vmatprep.subr.mxu1 %v1279_v8 }
  0x95   :  { %1050 = vmatpush3.msra.mxu1 %v1279_v8  ;;  %v149_v6 = vand.u32 4294901760, %v148_v5  ;;  %v157_v7 = vand.u32 4294901760, %v1507_v0 }
  0x96   :  { %1051 = vmatprep.subr.mxu1 %v1281_v9 }
  0x97   :  { %1052 = vmatpush3.msra.mxu1 %v1281_v9  ;;  %974 = vmatprep.mubr.f32.mxu0 %v149_v6  ;;  %v158_v36 = vsub.f32 %v1507_v0, %v157_v7 }
  0x98   :  { %1053 = vmatprep.subr.mxu1 %v1283_v10 }
  0x99   :  { %1054 = vmatpush3.msra.mxu1 %v1283_v10  ;;  %v159_v43 = vand.u32 4294901760, %v158_v36 }
  0x9a   :  { %1055 = vmatprep.subr.mxu1 %v1288_v15 }
  0x9b   :  { %1056 = vmatpush3.msra.mxu1 %v1288_v15  ;;  %975 = vmatmul.mubr.f32.vlgmr.msra.gmra.mxu0 %v159_v43 }
  0x9c   :  { %1013 = vmatpush3.msra.mxu0 %v1286_v14  ;;  %1057 = vmatprep.subr.mxu1 %v1291_v16 }
  0x9d   :  { %1014 = vmatprep.subr.mxu0 %v1296_v19  ;;  %1044 = vmatprep.mubr.f32.mxu0 %v146_v55 }
  0x9e   :  { %1058 = vmatpush3.msra.mxu1 %v1291_v16  ;;  %1015 = vmatpush3.msra.mxu0 %v1296_v19 }
  0x9f   :  { %1059 = vmatprep.subr.mxu1 %v1293_v17  ;;  %1016 = vmatprep.subr.mxu0 %v1299_v20 }
  0xa0   :  { %1060 = vmatpush3.msra.mxu1 %v1293_v17  ;;  %1017 = vmatpush3.msra.mxu0 %v1299_v20 }
  0xa1   :  { %1061 = vmatprep.subr.mxu1 %v1305_v22  ;;  %1018 = vmatprep.subr.mxu0 %v1302_v21 }
  0xa2   :  { %1062 = vmatpush3.msra.mxu1 %v1305_v22  ;;  %1019 = vmatpush3.msra.mxu0 %v1302_v21 }
  0xa3   :  { %1063 = vmatprep.subr.mxu1 %v1356_v46  ;;  %1020 = vmatprep.subr.mxu0 %v1311_v24 }
  0xa4   :  { %1064 = vmatpush3.msra.mxu1 %v1356_v46  ;;  %1021 = vmatpush3.msra.mxu0 %v1311_v24 }
  0xa5   :  { %1065 = vmatprep.subr.mxu1 %v1363_v48  ;;  %1022 = vmatprep.subr.mxu0 %v1314_v25 }
  0xa6   :  { %1066 = vmatpush3.msra.mxu1 %v1363_v48  ;;  %1023 = vmatpush3.msra.mxu0 %v1314_v25 }
  0xa7   :  { %1067 = vmatprep.subr.mxu1 %v1365_v49  ;;  %1024 = vmatprep.subr.mxu0 %v1328_v29 }
  0xa8   :  { %1068 = vmatpush3.msra.mxu1 %v1365_v49  ;;  %1025 = vmatpush3.msra.mxu0 %v1328_v29 }
  0xa9   :  { %1069 = vmatprep.subr.mxu1 %v1373_v54  ;;  %1026 = vmatprep.subr.mxu0 %v1342_v34 }
  0xaa   :  { %1070 = vmatpush3.msra.mxu1 %v1373_v54  ;;  %1027 = vmatpush3.msra.mxu0 %v1342_v34 }
  0xab   :  { %1071 = vmatprep.subr.mxu1 %v1388_v61  ;;  %1028 = vmatprep.subr.mxu0 %v1370_v53 }
  0xac   :  { %1072 = vmatpush3.msra.mxu1 %v1388_v61  ;;  %1029 = vmatpush3.msra.mxu0 %v1370_v53 }
  0xad   :  { %1073 = vmatprep.subr.mxu1 %v1400_v3  ;;  %1030 = vmatprep.subr.mxu0 %v1378_v56 }
  0xae   :  { %1074 = vmatpush3.msra.mxu1 %v1400_v3  ;;  %1031 = vmatpush3.msra.mxu0 %v1378_v56 }
  0xaf   :  { %1075 = vmatprep.subr.mxu1 %v1412_v13  ;;  %1032 = vmatprep.subr.mxu0 %v1385_v60  ;;  %v754_v21 = vpop.permute.xlu1 %753 }
  0xb0   :  { %1076 = vmatpush3.msra.mxu1 %v1412_v13  ;;  %1033 = vmatpush3.msra.mxu0 %v1385_v60  ;;  %vm758_vm3 = vcmp.eq.s32.totalorder %v1483_v37, %v754_v21 }
  0xb1   :  { %1077 = vmatprep.subr.mxu1 %v1424_v35  ;;  %1034 = vmatprep.subr.mxu0 %v1397_v2 }
  0xb2   :  { %1078 = vmatpush3.msra.mxu1 %v1424_v35  ;;  %1035 = vmatpush3.msra.mxu0 %v1397_v2 }
  0xb3   :  { %1080 = vmatmul.mubr.f32.vlgmr.msra.gmra.mxu1 %v157_v7  ;;  %1117 = vmatprep.subr.mxu1 %v1277_v4 }
  0xb4   :  { %1036 = vmatprep.subr.mxu0 %v1409_v12  ;;  %1118 = vmatpush3.msra.mxu1 %v1277_v4 }
  0xb5   :  { %1149 = vmatprep.mubr.msk.f32.mxu1 %vm42_vm0, %v1236_v51  ;;  %1037 = vmatpush3.msra.mxu0 %v1409_v12 }
  0xb6   :  { %1119 = vmatprep.subr.mxu1 %v1279_v8  ;;  %1038 = vmatprep.subr.mxu0 %v1421_v33 }
  0xb7   :  { %1120 = vmatpush3.msra.mxu1 %v1279_v8  ;;  %1039 = vmatpush3.msra.mxu0 %v1421_v33 }
  0xb8   :  { %1121 = vmatprep.subr.mxu1 %v1281_v9  ;;  %1040 = vmatprep.subr.mxu0 %v1433_v40 }
  0xb9   :  { %1122 = vmatpush3.msra.mxu1 %v1281_v9  ;;  %1041 = vmatpush3.msra.mxu0 %v1433_v40 }
  0xba   :  { %1123 = vmatprep.subr.mxu1 %v1283_v10  ;;  %1042 = vmatprep.subr.mxu0 %v1443_v45 }
  0xbb   :  { %1124 = vmatpush3.msra.mxu1 %v1283_v10  ;;  %1043 = vmatpush3.msra.mxu0 %v1443_v45 }
  0xbc   :  { %1125 = vmatprep.subr.mxu1 %v1288_v15  ;;  %1045 = vmatmul.mubr.f32.vlgmr.msra.gmra.mxu0 %v1507_v0 }
  0xbd   :  { %1082 = vmatprep.subr.mxu0 %v1308_v23  ;;  %1126 = vmatpush3.msra.mxu1 %v1288_v15 }
  0xbe   :  { %1083 = vmatpush3.msra.mxu0 %v1308_v23  ;;  %1114 = vmatprep.mubr.msk.f32.mxu0 %vm42_vm0, %v1236_v51 }
  0xbf   :  { %1127 = vmatprep.subr.mxu1 %v1291_v16  ;;  %1084 = vmatprep.subr.mxu0 %v1318_v26 }
  0xc0   :  { %1128 = vmatpush3.msra.mxu1 %v1291_v16  ;;  %1085 = vmatpush3.msra.mxu0 %v1318_v26 }
  0xc1   :  { %1129 = vmatprep.subr.mxu1 %v1293_v17  ;;  %1086 = vmatprep.subr.mxu0 %v1321_v27 }
  0xc2   :  { %1130 = vmatpush3.msra.mxu1 %v1293_v17  ;;  %1087 = vmatpush3.msra.mxu0 %v1321_v27 }
  0xc3   :  { %1131 = vmatprep.subr.mxu1 %v1305_v22  ;;  %1088 = vmatprep.subr.mxu0 %v1324_v28 }
  0xc4   :  { %1132 = vmatpush3.msra.mxu1 %v1305_v22  ;;  %1089 = vmatpush3.msra.mxu0 %v1324_v28  ;;  %v757_v28 = vpop.permute.xlu1 %756 }
  0xc5   :  { %1133 = vmatprep.subr.mxu1 %v1356_v46  ;;  %1090 = vmatprep.subr.mxu0 %v1333_v31  ;;  %vm759_vm2 = vcmp.eq.s32.totalorder %v1483_v37, %v757_v28 }
  0xc6   :  { %1134 = vmatpush3.msra.mxu1 %v1356_v46  ;;  %1091 = vmatpush3.msra.mxu0 %v1333_v31 }
  0xc7   :  { %1135 = vmatprep.subr.mxu1 %v1363_v48  ;;  %1092 = vmatprep.subr.mxu0 %v1347_v38 }
  0xc8   :  { %1136 = vmatpush3.msra.mxu1 %v1363_v48  ;;  %1093 = vmatpush3.msra.mxu0 %v1347_v38 }
  0xc9   :  { %1137 = vmatprep.subr.mxu1 %v1365_v49  ;;  %1094 = vmatprep.subr.mxu0 %v1351_v42 }
  0xca   :  { %1138 = vmatpush3.msra.mxu1 %v1365_v49  ;;  %1095 = vmatpush3.msra.mxu0 %v1351_v42 }
  0xcb   :  { %1139 = vmatprep.subr.mxu1 %v1373_v54  ;;  %1096 = vmatprep.subr.mxu0 %v1360_v47 }
  0xcc   :  { %1140 = vmatpush3.msra.mxu1 %v1373_v54  ;;  %1097 = vmatpush3.msra.mxu0 %v1360_v47 }
  0xcd   :  { %1141 = vmatprep.subr.mxu1 %v1388_v61  ;;  %1098 = vmatprep.subr.mxu0 %v1382_v59 }
  0xce   :  { %1142 = vmatpush3.msra.mxu1 %v1388_v61  ;;  %1099 = vmatpush3.msra.mxu0 %v1382_v59 }
  0xcf   :  { %1143 = vmatprep.subr.mxu1 %v1400_v3  ;;  %1100 = vmatprep.subr.mxu0 %v1394_v1 }
  0xd0   :  { %1144 = vmatpush3.msra.mxu1 %v1400_v3  ;;  %1101 = vmatpush3.msra.mxu0 %v1394_v1 }
  0xd1   :  { %1145 = vmatprep.subr.mxu1 %v1412_v13  ;;  %1102 = vmatprep.subr.mxu0 %v1406_v11 }
  0xd2   :  { %1146 = vmatpush3.msra.mxu1 %v1412_v13  ;;  %1103 = vmatpush3.msra.mxu0 %v1406_v11 }
  0xd3   :  { %1147 = vmatprep.subr.mxu1 %v1424_v35  ;;  %1104 = vmatprep.subr.mxu0 %v1418_v32 }
  0xd4   :  { %1148 = vmatpush3.msra.mxu1 %v1424_v35  ;;  %1105 = vmatpush3.msra.mxu0 %v1418_v32 }
  0xd5   :  { %1150 = vmatmul.mubr.msk.f32.vlgmr.msra.gmra.mxu1 %vm43_vm1, %v1236_v51  ;;  %1106 = vmatprep.subr.mxu0 %v1430_v39 }
  0xd6   :  { %1107 = vmatpush3.msra.mxu0 %v1430_v39 }
  0xd7   :  { %1108 = vmatprep.subr.mxu0 %v1440_v44 }
  0xd8   :  { %1109 = vmatpush3.msra.mxu0 %v1440_v44 }
  0xd9   :  { %1110 = vmatprep.subr.mxu0 %v1450_v52 }
  0xda   :  { %1111 = vmatpush3.msra.mxu0 %v1450_v52 }
  0xdb   :  { %1112 = vmatprep.subr.mxu0 %v1457_v58 }
  0xdc   :  { %1113 = vmatpush3.msra.mxu0 %v1457_v58 }
  0xdd   :  { %1115 = vmatmul.mubr.msk.f32.vlgmr.msra.gmra.mxu0 %vm43_vm1, %v1236_v51 }
 0x152   :  { %v1011_v8 = vpop.f32.mrf.mxu1 }
 0x154   :  { %v312_v14 = vpop.f32.mrf.mxu1 }
 0x15b   :  { %v976_v4 = vpop.f32.mrf.mxu0 }
 0x15c   :  { %v319_v15 = vadd.f32 %v1011_v8, %v976_v4 }
 0x15d   :  { %v151_v9 = vpop.f32.mrf.mxu0 }
 0x15e   :  { %v313_v19 = vadd.f32 %v312_v14, %v151_v9 }
 0x173   :  { %v1081_v16 = vpop.f32.mrf.mxu1 }
 0x175   :  { %v518_v23 = vpop.f32.mrf.mxu1 }
 0x17c   :  { %v1046_v10 = vpop.f32.mrf.mxu0 }
 0x17d   :  { %v430_v20 = vadd.f32 %v1046_v10, %v319_v15 }
 0x17e   :  { %v422_v17 = vpop.f32.mrf.mxu0 }
 0x17f   :  { %v423_v22 = vadd.f32 %v422_v17, %v313_v19  ;;  %v527_v24 = vadd.f32 %v1081_v16, %v430_v20 }
 0x181   :  { %v519_v29 = vadd.f32 %v518_v23, %v423_v22 }
 0x195   :  { %v1151_v25 = vpop.f32.mrf.mxu1 }
 0x197   :  { %v738_v42 = vpop.f32.mrf.mxu1 }
 0x19d   :  { %v1116_v26 = vpop.f32.mrf.mxu0 }
 0x19e   :  { %v652_v27 = vadd.f32 %v1116_v26, %v527_v24 }
 0x19f   :  { %v645_v31 = vpop.f32.mrf.mxu0 }
 0x1a0   :  { %v745_v34 = vadd.f32 %v1151_v25, %v652_v27  ;;  %v646_v38 = vadd.f32 %v645_v31, %v519_v29 }
 0x1a2   :  { %749 = vst [vmem:[#allocation5 + $0x8] sm:$0xff] %v745_v34  ;;  %v739_v46 = vadd.f32 %v738_v42, %v646_v38  ;;  %v761_v47 = vsel %vm759_vm2, %v745_v34, 0.0 }
 0x1a3   :  { %764 = vadd.xlane.f32.xlu1 %v761_v47 }
 0x1a4   :  { %748 = vst [vmem:[#allocation5] sm:$0xff] %v739_v46  ;;  %v760_v48 = vsel %vm758_vm3, %v739_v46, 0.0 }
 0x1a5   :  { %762 = vadd.xlane.f32.xlu0 %v760_v48 }
 0x22c   :  { %v765_v49 = vpop.xlane.xlu1 %764 }
 0x22d   :  { %v769_v53 = vsub.f32 %v745_v34, %v765_v49 }
 0x22e   :  { %v763_v54 = vpop.xlane.xlu0 %762 }
 0x22f   :  { %v768_v56 = vsub.f32 %v739_v46, %v763_v54  ;;  %774 = vrot.lane.b32.xlu1 %v769_v53, %s1237_s1 }
 0x231   :  { %772 = vrot.lane.b32.xlu0 %v768_v56, %s1237_s1 }
 0x2a1   :  { %v775_v59 = vpop.permute.xlu1 %774 }
 0x2a2   :  { %v779_v60 = vsel %vm767_vm4, %v775_v59, 0.0 }
 0x2a3   :  { %v773_v61 = vpop.permute.xlu0 %772  ;;  %v782_v2 = vsel %vm780_vm6, %v779_v60, 0.0 }
 0x2a4   :  { %v778_v1 = vsel %vm766_vm5, %v773_v61, 0.0 }
 0x2a5   :  { %v781_v3 = vsel %vm780_vm6, %v778_v1, 0.0 }
 0x2a6   :  { %v783_v11 = vadd.f32 %v782_v2, %v781_v3 }
 0x2a8   :  { %784 = vadd.xlane.f32.xlu0 %v783_v11 }
 0x2a9   :  { %1196 = shalt.err (!%p1193_p9)
}
 0x2aa   :  { %806 = dma.vmem_to_hbm [thread:$0]  %s801_s29, 256, %s1670_s3, [#allocation4], %s1232_s18, %s1232_s18, %s1233_s19  }
 0x2ab   :  { %s1239_s7 = smov [#allocation6]  }
 0x2ac   :  { %s813_s8 = sshll.u32 %s1239_s7, 4  ;;  %s814_s8 = int_to_ptr.vmem [resolvable:$true] %s813_s8 }
 0x2ad   :  { %s1205_s10 = scalar_lea.vmem %s814_s8, 128  ;;  %p1210_p11 = scmp.lt.s32.totalorder %s814_s8, %s814_s8 }
 0x2ae   :  { %p1206_p10 = scmp.ne.s32.totalorder %s814_s8, %s1205_s10  ;;  %p1211_p12 = scmp.lt.s32.totalorder %s1205_s10, %s1205_s10 }
 0x2b0   :  { %p1212_p13 = por %p1211_p12, %p1210_p11 }
 0x2b2   :  { %p1213_p0 = pnand %p1212_p13, %p1206_p10 }
 0x331   :  { %v785_v12 = vpop.xlane.xlu0 %784 }
 0x332   :  { %v786_v13 = vrot.slane %v785_v12, 4 }
 0x334   :  { %v787_v32 = vadd.f32 %v786_v13, %v785_v12 }
 0x336   :  { %v788_v33 = vrot.slane %v787_v32, 2 }
 0x338   :  { %v789_v35 = vadd.f32 %v788_v33, %v787_v32 }
 0x33a   :  { %v790_v39 = vrot.slane %v789_v35, 1 }
 0x33c   :  { %v791_v40 = vadd.f32 %v790_v39, %v789_v35 }
 0x33e   :  { %1152 = vpush %v791_v40 }
 0x36f   :  { %s1153_s9 = spop %1152 }
 0x370   :  { %v793_v44 = vstv %s1153_s9 }
 0x371   :  { %794 = vst [vmem:[#allocation6] sm:$0xff] %v793_v44 }
 0x372   :  { %1216 = shalt.err (!%p1213_p0)
}
 0x373   :  { %816 = dma.vmem_to_hbm [thread:$0]  %s814_s8, 128, %s1671_s4, [#allocation7]  }
 0x374   :  { %1227 = dma.done.wait [#allocation4], 256  }
 0x375   :  { %1228 = vsyncadd [#allocation4], 4294967040 }
 0x376   :  { %1229 = dma.done.wait [#allocation7], 128  }
 0x377   :  { %1230 = vsyncadd [#allocation7], 4294967168 }
 0x378   :  { %823 = vsyncpa [#allocation3], 1 }
 0x379   :  { %824 = vsyncpa [#allocation4], 1 }
 0x37a   :  { %825 = vsyncpa [#allocation7], 1 }

</bundles_post_ra>
